<compile_context>
chip_gen: v7x
topology: tpu7x:2x2x1
jax: 0.10.0
libtpu: 0.0.40
codegen_flags: <defaults>
</compile_context>

<pallas_src>
import functools

import jax
import jax.numpy as jnp
from jax.experimental import pallas as pl
from jax.experimental.pallas import tpu as pltpu

LANE = 128


def _copy_kernel(x_ref, o_ref):
    # Identity copy of the current (tile_rows, width) tile.
    o_ref[...] = x_ref[...]


def _validate_as_shape(as_shape):
    # Mirror View.validate_as_shape semantics.
    assert all([isinstance(_s, int) or _s == 'x' for _s in as_shape])
    all_int_indices = [_n for _n, _s in enumerate(as_shape) if isinstance(_s, int)]
    if all_int_indices:
        first_int_at_index = all_int_indices[0]
        assert all([isinstance(_s, int) for _s in as_shape[first_int_at_index:]])
    return as_shape


def _resolve_shape(x, as_shape):
    as_shape = _validate_as_shape(as_shape)
    input_shape = list(x.shape)
    return [_s if isinstance(_s, int) else input_shape[_n]
            for _n, _s in enumerate(as_shape)]


def _round_up(a, b):
    return -(-a // b) * b


@functools.lru_cache(maxsize=None)
def _chip_tuning():
    """Returns (target_tile_bytes, vmem_limit_bytes) per TPU generation."""
    kind = ""
    try:
        kind = jax.devices()[0].device_kind.lower()
    except Exception:
        pass
    is_v7 = "v7" in kind
    if not is_v7:
        # Cross-check via physical VMEM size when available (v7x: 64 MiB/TC).
        try:
            vmem = getattr(pltpu.get_tpu_info(), "vmem_capacity_bytes", None)
            is_v7 = vmem is not None and vmem <= 80 * 1024 * 1024
        except Exception:
            pass
    if is_v7:
        # ~3.2 TB/s HBM: 8 MiB tiles keep the ~0.35us/step overhead <~7%.
        # 2 arrays x 2 bufs x 8 MiB = 32 MiB double-buffered, so raise the
        # limit above the 32 MiB scoped default (64 MiB physical).
        return 8 * 1024 * 1024, 44 * 1024 * 1024
    # v5e/v6e (0.8-1.4 TB/s, 128 MiB VMEM): 2 MiB tiles already amortize the
    # per-step overhead to <~10%; leave VMEM headroom for neighbors.
    return 2 * 1024 * 1024, 32 * 1024 * 1024


def _pallas_identity_copy(x):
    """Materializing row-major copy of `x` through a tiled Pallas kernel.

    Returns the flat (1-D) copy of length x.size.
    """
    total = x.size
    itemsize = jnp.dtype(x.dtype).itemsize
    # Minimum sublane rows per tile: f32 -> 8, bf16/f16 -> 16, int8/fp8 -> 32.
    min_rows = max(8, 32 // itemsize)

    target_tile_bytes, vmem_limit = _chip_tuning()

    # Lane-dense slab width: widest multiple of 128 that divides the flat size.
    width = LANE
    for cand in (1024, 512, 256):
        if total % cand == 0:
            width = cand
            break

    rows = -(-total // width)
    padded_total = rows * width

    flat = x.reshape(-1)  # row-major flatten == torch.view contiguity
    if padded_total != total:
        # Sub-width tail only (< 128*itemsize bytes of padding); the common
        # tile-aligned case (e.g. NCHW power-of-two sizes) skips this.
        flat = jnp.pad(flat, (0, padded_total - total))
    x2 = flat.reshape(rows, width)

    if rows <= min_rows:
        # Single block spanning the full row extent; a block dim equal to the
        # array dim satisfies the (8, 128) rule even when not a multiple of 8.
        tile_rows = rows
    else:
        # Large row tiles amortize the ~600-cycle per-step overhead on this
        # DMA-bound copy ...
        target_rows = max(min_rows,
                          (target_tile_bytes // itemsize // width)
                          // min_rows * min_rows)
        # ... but keep >=4 grid steps so ("parallel",) can balance the work
        # across v7x's two TensorCores on mid-sized buffers.
        quarter = max(min_rows, _round_up(-(-rows // 4), min_rows))
        tile_rows = min(target_rows, quarter)

    grid = (pl.cdiv(rows, tile_rows),)

    out2 = pl.pallas_call(
        _copy_kernel,
        out_shape=jax.ShapeDtypeStruct((rows, width), x.dtype),
        grid_spec=pltpu.PrefetchScalarGridSpec(
            num_scalar_prefetch=0,
            grid=grid,
            in_specs=[pl.BlockSpec((tile_rows, width), lambda i: (i, 0))],
            out_specs=pl.BlockSpec((tile_rows, width), lambda i: (i, 0)),
        ),
        # Pure-bandwidth custom call: tell XLA what it costs.
        cost_estimate=pl.CostEstimate(
            flops=0,
            transcendentals=0,
            bytes_accessed=2 * padded_total * itemsize),
        compiler_params=pltpu.CompilerParams(
            dimension_semantics=("parallel",),   # shard the copy across TCs (v7x)
            vmem_limit_bytes=vmem_limit),
    )(x2)

    flat_out = out2.reshape(-1)
    if padded_total != total:
        flat_out = flat_out[:total]
    return flat_out


@functools.partial(jax.jit, static_argnames=("as_shape", "materialize"))
def view_forward(x, as_shape, materialize=False):
    """Pallas implementation of View.forward(x).

    Default path is metadata-only (like torch.view: zero data movement).
    `materialize=True` routes the data through the Pallas copy kernel.
    """
    reshaped_shape = _resolve_shape(x, as_shape)
    if not materialize:
        # Fast path: view is contiguity-preserving, so this is pure metadata
        # (0 HBM bytes) — the highest-value optimization for this module.
        return jnp.reshape(x, reshaped_shape)
    flat_out = _pallas_identity_copy(x)
    return flat_out.reshape(reshaped_shape)


if __name__ == "__main__":
    key = jax.random.PRNGKey(0)
    # Small NCHW input: batch=2, channels=4, spatial=16x16.
    x = jax.random.normal(key, (2, 4, 16, 16), dtype=jnp.float32)

    # Case 1: as_shape = ('x', -1): keep batch dim, flatten the rest
    # (explicit Pallas copy path).
    out = jax.block_until_ready(view_forward(x, ('x', -1), materialize=True))
    ref = jnp.reshape(x, (x.shape[0], -1))
    assert out.shape == ref.shape, (out.shape, ref.shape)
    assert out.dtype == ref.dtype
    assert bool(jnp.all(out == ref))

    # Case 2: fully explicit integer shape with a leading 'x', via the kernel.
    out2 = jax.block_until_ready(view_forward(x, ('x', 4, 256), materialize=True))
    ref2 = jnp.reshape(x, (2, 4, 256))
    assert out2.shape == ref2.shape
    assert bool(jnp.all(out2 == ref2))

    # Case 3: default metadata-only fast path (no pallas_call, 0 HBM traffic).
    out3 = jax.block_until_ready(view_forward(x, ('x', -1)))
    assert out3.shape == ref.shape
    assert bool(jnp.all(out3 == ref))

    # Case 4: bf16 input exercises the full-array block on a sub-32-bit dtype.
    xb = x.astype(jnp.bfloat16)
    out4 = jax.block_until_ready(view_forward(xb, ('x', -1), materialize=True))
    ref4 = jnp.reshape(xb, (xb.shape[0], -1))
    assert out4.shape == ref4.shape
    assert bool(jnp.all(out4 == ref4))

    # Case 5: multi-step grid with a masked partial trailing block
    # (25 rows x 1024 lanes -> grid=(4,), last block has 1 valid row).
    x5 = jax.random.normal(jax.random.PRNGKey(1), (25, 32, 32), dtype=jnp.float32)
    out5 = jax.block_until_ready(view_forward(x5, ('x', -1), materialize=True))
    ref5 = jnp.reshape(x5, (25, -1))
    assert out5.shape == ref5.shape
    assert bool(jnp.all(out5 == ref5))

    # Case 6: non-128-aligned flat size (3*5*7*9 = 945) exercises the tiny
    # tail-pad path only (no full-buffer pad/slice for aligned sizes).
    x6 = jax.random.normal(jax.random.PRNGKey(2), (3, 5, 7, 9), dtype=jnp.float32)
    out6 = jax.block_until_ready(view_forward(x6, ('x', -1), materialize=True))
    ref6 = jnp.reshape(x6, (3, -1))
    assert out6.shape == ref6.shape
    assert bool(jnp.all(out6 == ref6))

    print("KERNEL_OK")
</pallas_src>

<mosaic_0001>
module attributes {stable_mosaic.version = 11 : i64} {
  func.func @_copy_kernel(%arg0: i32, %arg1: memref<2x1024xf32, #tpu.memory_space<vmem>>, %arg2: memref<2x1024xf32, #tpu.memory_space<vmem>>) attributes {dimension_semantics = [#tpu.dimension_semantics<parallel>], iteration_bounds = array<i64: 1>, scalar_prefetch = 0 : i64, scratch_operands = 0 : i64, tpu.core_type = #tpu.core_type<tc>, window_params = [{transform_indices = @transform_0, window_bounds = array<i64: 2, 1024>}, {transform_indices = @transform_1, window_bounds = array<i64: 2, 1024>}]} {
    %c0 = arith.constant 0 : index
    %c0_0 = arith.constant 0 : index
    %0 = vector.load %arg1[%c0, %c0_0] : memref<2x1024xf32, #tpu.memory_space<vmem>>, vector<2x1024xf32>
    %c0_1 = arith.constant 0 : index
    %c0_2 = arith.constant 0 : index
    %1 = vector.load %arg2[%c0_1, %c0_2] : memref<2x1024xf32, #tpu.memory_space<vmem>>, vector<2x1024xf32>
    tpu.vector_store %arg2[%c0_1, %c0_2], %0 {strides = array<i32>} : memref<2x1024xf32, #tpu.memory_space<vmem>>, vector<2x1024xf32>,
    return
  }
  func.func @transform_0(%arg0: i32) -> (i32, i32) {
    %c0_i32 = arith.constant 0 : i32
    %c0_i32_0 = arith.constant 0 : i32
    return %arg0, %c0_i32 : i32, i32
  }
  func.func @transform_1(%arg0: i32) -> (i32, i32) {
    %c0_i32 = arith.constant 0 : i32
    %c0_i32_0 = arith.constant 0 : i32
    return %arg0, %c0_i32 : i32, i32
  }
}

</mosaic_0001>

<bundles_post_ra>
// kernel: view_forward.1
= control target key start
LH: loop header
LB: loop body
LE: loop exit
PB: predicated region body
PF: predicated region fallthrough
CT: control target
= control target key end

     0   :  { %s81_s0 = inlined_call_operand.vmem [shape: f32[2,1024], index: 0, kind: input, shape index: {}]   ;;  %s82_s1 = inlined_call_operand.hbm [shape: f32[2,1024], index: 1, kind: output, shape index: {}]  }
   0x1   :  { %v9_v0 = vld [vmem:[%s81_s0] sm:$0xff]  ;;  %v10_v1 = vld [vmem:[%s81_s0 + $0x8] sm:$0xff] }
   0x2   :  { %6 = vsyncpa [#allocation3], 0  ;;  %11 = vst [vmem:[#allocation2] sm:$0xff] %v9_v0  ;;  %s52_s10 = smov [#allocation2]  }
   0x3   :  { %12 = vst [vmem:[#allocation2 + $0x8] sm:$0xff] %v10_v1  ;;  %s19_s11 = sshll.u32 %s52_s10, 4  ;;  %s20_s11 = int_to_ptr.vmem [resolvable:$true] %s19_s11 }
   0x4   :  { %s28_s12 = scalar_lea.vmem %s20_s11, 256  ;;  %p33_p1 = scmp.lt.s32.totalorder %s20_s11, %s20_s11 }
   0x5   :  { %p29_p0 = scmp.ne.s32.totalorder %s20_s11, %s28_s12  ;;  %p34_p2 = scmp.lt.s32.totalorder %s28_s12, %s28_s12 }
   0x7   :  { %p35_p3 = por %p34_p2, %p33_p1 }
   0x9   :  { %p36_p4 = pnand %p35_p3, %p29_p0 }
   0xb   :  { %39 = shalt.err (!%p36_p4)
}
   0xc   :  { %s40_s15 = scalar_lea.hbm %s82_s1, 256 }
   0xd   :  { %p41_p5 = scmp.ne.s32.totalorder %s82_s1, %s40_s15  ;;  %p44_p6 = scmp.lt.u32.totalorder %s40_s15, %s82_s1 }
   0xf   :  { %p46_p7 = pnand %p44_p6, %p41_p5 }
  0x11   :  { %49 = shalt.err (!%p46_p7)
}
  0x12   :  { %22 = dma.vmem_to_hbm [thread:$0]  %s20_s11, 256, %s82_s1, [#allocation3]  }
  0x13   :  { %50 = dma.done.wait [#allocation3], 256  }
  0x14   :  { %51 = vsyncadd [#allocation3], 4294967040 }
  0x15   :  { %26 = vsyncpa [#allocation3], 1 }

</bundles_post_ra>
